<compile_context>
chip_gen: v7x
topology: tpu7x:2x2x1
jax: 0.10.0
libtpu: 0.0.40
codegen_flags: <defaults>
</compile_context>

<pallas_src>
import functools

import jax
import jax.numpy as jnp
from jax import lax
from jax.experimental import pallas as pl
from jax.experimental.pallas import tpu as pltpu


# ---------------------------------------------------------------------------
# Kernels
# ---------------------------------------------------------------------------
def gat_project_kernel(x_ref, w_ref, asrc_ref, adst_ref, h_ref, ssrc_ref, sdst_ref):
    """H = X @ W (bf16 x bf16 -> f32 acc) and per-head attention scores."""
    h = jnp.dot(x_ref[...], w_ref[...], preferred_element_type=jnp.float32)
    hb = h.astype(jnp.bfloat16)
    h_ref[...] = hb
    ssrc_ref[...] = jnp.dot(hb, asrc_ref[...], preferred_element_type=jnp.float32)
    sdst_ref[...] = jnp.dot(hb, adst_ref[...], preferred_element_type=jnp.float32)


def gat_attention_kernel(a_ref, h_ref, ssrct_ref, sdst_ref, b_ref, o_ref, *,
                         heads, head_dim, negative_slope, mode, valid_cols):
    """Masked multi-head attention softmax + aggregation for one row tile of targets.

    a_ref      : [T, N]  bf16 {0,1} adjacency mask rows for this target tile
    h_ref      : [N, D]  bf16 projected features of ALL source nodes (D = heads*head_dim)
    ssrct_ref  : [H, N]  f32  per-head source attention scores (transposed)
    sdst_ref   : [T, H]  f32  per-head target attention scores for this tile
    b_ref      : [1, D]  f32  bias
    o_ref      : [T, D]  output tile (bf16 for layer 1, f32 for final layer)
    """
    neg = jnp.float32(-1e30)
    mask = a_ref[...] > 0                       # [T, N] bool
    h_full = h_ref[...]                         # [N, D] bf16
    s_src_t = ssrct_ref[...]                    # [H, N] f32
    s_dst = sdst_ref[...]                       # [T, H] f32

    head_outs = []
    for h in range(heads):
        e = s_dst[:, h:h + 1] + s_src_t[h:h + 1, :]            # [T, N]
        e = jnp.where(e > 0, e, negative_slope * e)            # LeakyReLU(0.2)
        e = jnp.where(mask, e, neg)                            # mask non-edges
        m = jnp.max(e, axis=-1, keepdims=True)
        p = jnp.where(mask, jnp.exp(e - m), 0.0)
        alpha = p / jnp.sum(p, axis=-1, keepdims=True)         # softmax over neighbors
        # TODO(synk): training-mode attention dropout (p=0.6) via pltpu.prng_random_bits.
        head_outs.append(
            jnp.dot(alpha.astype(jnp.bfloat16),
                    h_full[:, h * head_dim:(h + 1) * head_dim],
                    preferred_element_type=jnp.float32))       # [T, head_dim]

    out = head_outs[0] if heads == 1 else jnp.concatenate(head_outs, axis=-1)
    out = out + b_ref[...]

    if mode == "elu":
        out = jnp.where(out > 0, out, jnp.exp(out) - 1.0)
    else:  # "log_softmax" over the first `valid_cols` columns (rest is lane padding)
        col = lax.broadcasted_iota(jnp.int32, out.shape, 1)
        valid = col < valid_cols
        z = jnp.where(valid, out, neg)
        zmax = jnp.max(z, axis=-1, keepdims=True)
        s = z - zmax
        p = jnp.where(valid, jnp.exp(s), 0.0)
        out = s - jnp.log(jnp.sum(p, axis=-1, keepdims=True))

    o_ref[...] = out.astype(o_ref.dtype)


# ---------------------------------------------------------------------------
# Per-layer wrapper (two pallas_calls, row-tiled "parallel" grid)
# ---------------------------------------------------------------------------
def _gat_layer(a_mask, x, w, att_src_mat, att_dst_mat, bias, *, heads, head_dim,
               tile_n, negative_slope, mode, valid_cols, out_dtype):
    n, f_in = x.shape
    d = heads * head_dim
    grid = (n // tile_n,)
    parallel = pltpu.CompilerParams(dimension_semantics=("parallel",))

    h_full, s_src, s_dst = pl.pallas_call(
        gat_project_kernel,
        out_shape=(jax.ShapeDtypeStruct((n, d), jnp.bfloat16),
                   jax.ShapeDtypeStruct((n, heads), jnp.float32),
                   jax.ShapeDtypeStruct((n, heads), jnp.float32)),
        grid=grid,
        in_specs=[pl.BlockSpec((tile_n, f_in), lambda i: (i, 0)),
                  pl.BlockSpec((f_in, d), lambda i: (0, 0)),
                  pl.BlockSpec((d, heads), lambda i: (0, 0)),
                  pl.BlockSpec((d, heads), lambda i: (0, 0))],
        out_specs=(pl.BlockSpec((tile_n, d), lambda i: (i, 0)),
                   pl.BlockSpec((tile_n, heads), lambda i: (i, 0)),
                   pl.BlockSpec((tile_n, heads), lambda i: (i, 0))),
        compiler_params=parallel,
    )(x, w, att_src_mat, att_dst_mat)

    s_src_t = s_src.T  # [heads, n] — tiny host/XLA glue transpose

    kernel = functools.partial(
        gat_attention_kernel, heads=heads, head_dim=head_dim,
        negative_slope=negative_slope, mode=mode, valid_cols=valid_cols)

    return pl.pallas_call(
        kernel,
        out_shape=jax.ShapeDtypeStruct((n, d), out_dtype),
        grid=grid,
        in_specs=[pl.BlockSpec((tile_n, n), lambda i: (i, 0)),
                  pl.BlockSpec((n, d), lambda i: (0, 0)),
                  pl.BlockSpec((heads, n), lambda i: (0, 0)),
                  pl.BlockSpec((tile_n, heads), lambda i: (i, 0)),
                  pl.BlockSpec((1, d), lambda i: (0, 0))],
        out_specs=pl.BlockSpec((tile_n, d), lambda i: (i, 0)),
        compiler_params=parallel,
    )(a_mask, h_full, s_src_t, s_dst, bias)


# ---------------------------------------------------------------------------
# Host-side glue
# ---------------------------------------------------------------------------
def build_attention_mask(edge_index, num_nodes):
    """Dense {0,1} mask M[i, j] = 1 iff edge j->i exists or i == j (self loops)."""
    src, dst = edge_index[0], edge_index[1]
    m = jnp.zeros((num_nodes, num_nodes), jnp.float32)
    m = m.at[dst, src].set(1.0)
    return jnp.maximum(m, jnp.eye(num_nodes, dtype=jnp.float32))


def _att_matrix(att):
    """[heads, C] attention vector -> block-diagonal [heads*C, heads] matrix so that
    s = H @ att_matrix gives per-head scores in one matmul."""
    heads, c = att.shape
    rows = jnp.arange(heads * c)
    m = jnp.zeros((heads * c, heads), jnp.float32)
    return m.at[rows, rows // c].set(att.reshape(-1))


def gat_forward(x, edge_index, params, *, tile_n=None, negative_slope=0.2):
    n = x.shape[0]
    heads, head_dim = params["att_src1"].shape
    d1 = heads * head_dim
    output_dim = params["w2"].shape[1]
    out_pad = max(128, pl.cdiv(output_dim, 128) * 128)   # lane-dense final output

    if tile_n is None:
        tile_n = n if n <= 256 else 256
    assert n % tile_n == 0 and (tile_n % 8 == 0 or tile_n == n)

    a_mask = build_attention_mask(edge_index, n).astype(jnp.bfloat16)

    # TODO(synk): training-mode input dropout (p=0.6); identity in eval mode.
    h1 = _gat_layer(
        a_mask, x.astype(jnp.bfloat16),
        params["w1"].astype(jnp.bfloat16),
        _att_matrix(params["att_src1"]).astype(jnp.bfloat16),
        _att_matrix(params["att_dst1"]).astype(jnp.bfloat16),
        params["b1"].reshape(1, d1),
        heads=heads, head_dim=head_dim, tile_n=tile_n,
        negative_slope=negative_slope, mode="elu", valid_cols=d1,
        out_dtype=jnp.bfloat16)

    # TODO(synk): training-mode inter-layer dropout (p=0.6); identity in eval mode.

    # Pad the final layer's feature dim to a 128-lane multiple (zeros are inert).
    w2p = jnp.zeros((d1, out_pad), jnp.float32).at[:, :output_dim].set(params["w2"])
    asrc2 = jnp.zeros((1, out_pad), jnp.float32).at[:, :output_dim].set(params["att_src2"])
    adst2 = jnp.zeros((1, out_pad), jnp.float32).at[:, :output_dim].set(params["att_dst2"])
    b2p = jnp.zeros((1, out_pad), jnp.float32).at[:, :output_dim].set(
        params["b2"].reshape(1, -1))

    z = _gat_layer(
        a_mask, h1, w2p.astype(jnp.bfloat16),
        _att_matrix(asrc2).astype(jnp.bfloat16),
        _att_matrix(adst2).astype(jnp.bfloat16),
        b2p,
        heads=1, head_dim=out_pad, tile_n=tile_n,
        negative_slope=negative_slope, mode="log_softmax", valid_cols=output_dim,
        out_dtype=jnp.float32)

    return z[:, :output_dim]


def init_params(key, input_dim, head_dim, heads, output_dim):
    ks = jax.random.split(key, 6)
    d1 = heads * head_dim

    def glorot(k, shape):
        scale = jnp.sqrt(2.0 / jnp.float32(shape[0] + shape[-1]))
        return jax.random.normal(k, shape, jnp.float32) * scale

    return {
        "w1": glorot(ks[0], (input_dim, d1)),
        "att_src1": glorot(ks[1], (heads, head_dim)),
        "att_dst1": glorot(ks[2], (heads, head_dim)),
        "b1": jnp.zeros((d1,), jnp.float32),
        "w2": glorot(ks[3], (d1, output_dim)),
        "att_src2": glorot(ks[4], (1, output_dim)),
        "att_dst2": glorot(ks[5], (1, output_dim)),
        "b2": jnp.zeros((output_dim,), jnp.float32),
    }


if __name__ == "__main__":
    key = jax.random.PRNGKey(0)
    k_x, k_p = jax.random.split(key)

    N = 128          # graph nodes
    INPUT_DIM = 16   # input feature dim
    HEADS = 8        # conv1 heads (module-fixed)
    HEAD_DIM = 8     # conv1 per-head dim (module-fixed)
    OUTPUT_DIM = 7   # output classes

    # deterministic node features
    x = jax.random.normal(k_x, (N, INPUT_DIM), jnp.float32)

    # deterministic graph: bidirectional ring + skip-2 edges, edge_index: [2, E]
    idx = jnp.arange(N)
    src = jnp.concatenate([idx, (idx + 1) % N, idx, (idx + 2) % N])
    dst = jnp.concatenate([(idx + 1) % N, idx, (idx + 2) % N, idx])
    edge_index = jnp.stack([src, dst], axis=0).astype(jnp.int32)

    params = init_params(k_p, INPUT_DIM, HEAD_DIM, HEADS, OUTPUT_DIM)

    out = gat_forward(x, edge_index, params, tile_n=64)
    jax.block_until_ready(out)

    assert out.shape == (N, OUTPUT_DIM)
    assert bool(jnp.all(jnp.isfinite(out)))
    # each row of the log_softmax output must sum (in prob space) to 1
    row_sums = jnp.sum(jnp.exp(out), axis=1)
    assert jnp.allclose(row_sums, 1.0, atol=1e-4)
    print("KERNEL_OK")
</pallas_src>

<mosaic_0001>
module attributes {stable_mosaic.version = 11 : i64} {
  func.func @gat_project_kernel(%arg0: i32, %arg1: memref<64x16xbf16, #tpu.memory_space<vmem>>, %arg2: memref<16x64xbf16, #tpu.memory_space<vmem>>, %arg3: memref<64x8xbf16, #tpu.memory_space<vmem>>, %arg4: memref<64x8xbf16, #tpu.memory_space<vmem>>, %arg5: memref<64x64xbf16, #tpu.memory_space<vmem>>, %arg6: memref<64x8xf32, #tpu.memory_space<vmem>>, %arg7: memref<64x8xf32, #tpu.memory_space<vmem>>) attributes {dimension_semantics = [#tpu.dimension_semantics<parallel>], iteration_bounds = array<i64: 2>, scalar_prefetch = 0 : i64, scratch_operands = 0 : i64, tpu.core_type = #tpu.core_type<tc>, window_params = [{transform_indices = @transform_0, window_bounds = array<i64: 64, 16>}, {pipeline_mode = #tpu.pipeline_mode<synchronous>, transform_indices = @transform_1, window_bounds = array<i64: 16, 64>}, {pipeline_mode = #tpu.pipeline_mode<synchronous>, transform_indices = @transform_2, window_bounds = array<i64: 64, 8>}, {pipeline_mode = #tpu.pipeline_mode<synchronous>, transform_indices = @transform_3, window_bounds = array<i64: 64, 8>}, {transform_indices = @transform_4, window_bounds = array<i64: 64, 64>}, {transform_indices = @transform_5, window_bounds = array<i64: 64, 8>}, {transform_indices = @transform_6, window_bounds = array<i64: 64, 8>}]} {
    %c0 = arith.constant 0 : index
    %c0_0 = arith.constant 0 : index
    %0 = vector.load %arg1[%c0, %c0_0] : memref<64x16xbf16, #tpu.memory_space<vmem>>, vector<64x16xbf16>
    %c0_1 = arith.constant 0 : index
    %c0_2 = arith.constant 0 : index
    %1 = vector.load %arg2[%c0_1, %c0_2] : memref<16x64xbf16, #tpu.memory_space<vmem>>, vector<16x64xbf16>
    %cst = arith.constant dense<0.000000e+00> : vector<64x64xf32>
    %2 = tpu.matmul %0, %1, %cst {dimension_numbers = #tpu.dot_dimension_numbers<[1], [0], [0], [1], [0, 0, 1, 1], [], []>} : vector<64x16xbf16>, vector<16x64xbf16>, vector<64x64xf32> -> vector<64x64xf32>
    %3 = arith.truncf %2 : vector<64x64xf32> to vector<64x64xbf16>
    %c0_3 = arith.constant 0 : index
    %c0_4 = arith.constant 0 : index
    %4 = vector.load %arg5[%c0_3, %c0_4] : memref<64x64xbf16, #tpu.memory_space<vmem>>, vector<64x64xbf16>
    tpu.vector_store %arg5[%c0_3, %c0_4], %3 {strides = array<i32>} : memref<64x64xbf16, #tpu.memory_space<vmem>>, vector<64x64xbf16>,
    %c0_5 = arith.constant 0 : index
    %c0_6 = arith.constant 0 : index
    %5 = vector.load %arg3[%c0_5, %c0_6] : memref<64x8xbf16, #tpu.memory_space<vmem>>, vector<64x8xbf16>
    %cst_7 = arith.constant dense<0.000000e+00> : vector<64x8xf32>
    %6 = tpu.matmul %3, %5, %cst_7 {dimension_numbers = #tpu.dot_dimension_numbers<[1], [0], [0], [1], [0, 0, 1, 1], [], []>} : vector<64x64xbf16>, vector<64x8xbf16>, vector<64x8xf32> -> vector<64x8xf32>
    %c0_8 = arith.constant 0 : index
    %c0_9 = arith.constant 0 : index
    %7 = vector.load %arg6[%c0_8, %c0_9] : memref<64x8xf32, #tpu.memory_space<vmem>>, vector<64x8xf32>
    tpu.vector_store %arg6[%c0_8, %c0_9], %6 {strides = array<i32>} : memref<64x8xf32, #tpu.memory_space<vmem>>, vector<64x8xf32>,
    %c0_10 = arith.constant 0 : index
    %c0_11 = arith.constant 0 : index
    %8 = vector.load %arg4[%c0_10, %c0_11] : memref<64x8xbf16, #tpu.memory_space<vmem>>, vector<64x8xbf16>
    %cst_12 = arith.constant dense<0.000000e+00> : vector<64x8xf32>
    %9 = tpu.matmul %3, %8, %cst_12 {dimension_numbers = #tpu.dot_dimension_numbers<[1], [0], [0], [1], [0, 0, 1, 1], [], []>} : vector<64x64xbf16>, vector<64x8xbf16>, vector<64x8xf32> -> vector<64x8xf32>
    %c0_13 = arith.constant 0 : index
    %c0_14 = arith.constant 0 : index
    %10 = vector.load %arg7[%c0_13, %c0_14] : memref<64x8xf32, #tpu.memory_space<vmem>>, vector<64x8xf32>
    tpu.vector_store %arg7[%c0_13, %c0_14], %9 {strides = array<i32>} : memref<64x8xf32, #tpu.memory_space<vmem>>, vector<64x8xf32>,
    return
  }
  func.func @transform_0(%arg0: i32) -> (i32, i32) {
    %c0_i32 = arith.constant 0 : i32
    %c0_i32_0 = arith.constant 0 : i32
    return %arg0, %c0_i32 : i32, i32
  }
  func.func @transform_1(%arg0: i32) -> (i32, i32) {
    %c0_i32 = arith.constant 0 : i32
    %c0_i32_0 = arith.constant 0 : i32
    %c0_i32_1 = arith.constant 0 : i32
    return %c0_i32, %c0_i32_0 : i32, i32
  }
  func.func @transform_2(%arg0: i32) -> (i32, i32) {
    %c0_i32 = arith.constant 0 : i32
    %c0_i32_0 = arith.constant 0 : i32
    %c0_i32_1 = arith.constant 0 : i32
    return %c0_i32, %c0_i32_0 : i32, i32
  }
  func.func @transform_3(%arg0: i32) -> (i32, i32) {
    %c0_i32 = arith.constant 0 : i32
    %c0_i32_0 = arith.constant 0 : i32
    %c0_i32_1 = arith.constant 0 : i32
    return %c0_i32, %c0_i32_0 : i32, i32
  }
  func.func @transform_4(%arg0: i32) -> (i32, i32) {
    %c0_i32 = arith.constant 0 : i32
    %c0_i32_0 = arith.constant 0 : i32
    return %arg0, %c0_i32 : i32, i32
  }
  func.func @transform_5(%arg0: i32) -> (i32, i32) {
    %c0_i32 = arith.constant 0 : i32
    %c0_i32_0 = arith.constant 0 : i32
    return %arg0, %c0_i32 : i32, i32
  }
  func.func @transform_6(%arg0: i32) -> (i32, i32) {
    %c0_i32 = arith.constant 0 : i32
    %c0_i32_0 = arith.constant 0 : i32
    return %arg0, %c0_i32 : i32, i32
  }
}

</mosaic_0001>

<bundles_post_ra>
// kernel: tpu_custom_call.1
= control target key start
LH: loop header
LB: loop body
LE: loop exit
PB: predicated region body
PF: predicated region fallthrough
CT: control target
= control target key end

     0   :  { %s969_s21 = smov 0   ;;  %s1093_s0 = inlined_call_operand.vmem [shape: bf16[128,16], index: 0, kind: input, shape index: {}]   ;;  %s1094_s1 = inlined_call_operand.vmem [shape: bf16[16,64], index: 1, kind: input, shape index: {}]   ;;  %s1095_s2 = inlined_call_operand.vmem [shape: bf16[64,8], index: 2, kind: input, shape index: {}]   ;;  %s1096_s3 = inlined_call_operand.vmem [shape: bf16[64,8], index: 3, kind: input, shape index: {}]   ;;  %s1097_s4 = inlined_call_operand.vmem [shape: bf16[128,64], index: 4, kind: output, shape index: {0}]   ;;  %s1098_s5 = inlined_call_operand.vmem [shape: f32[128,8], index: 5, kind: output, shape index: {1}]   ;;  %s1099_s6 = inlined_call_operand.vmem [shape: f32[128,8], index: 6, kind: output, shape index: {2}]  }
   0x1 LB: > { %s786_s22 = sadd.s32 4294967295, %s932_s21   ;;  %p790_p0 = scmp.ge.s32.totalorder %s932_s21, 1  ;;  %s932_s21 = sphi %s969_s21, %s17_s21  }
   0x2   : > { %p218_p1 = scmp.lt.s32.totalorder %s932_s21, 3 }
   0x4   : > { %p219_p2 = pnand %p790_p0, %p218_p1 }
   0x5   : > { %v913_v0 = vld [vmem:[%s1094_s1] sm:$0xff] (!%p219_p2)   ;;  %s791_s25 = sshll.u32 (!%p219_p2), %s786_s22, 3  ;;  %v921_v3 = vld [vmem:[%s1095_s2 + $0x8] sm:$0xff] (!%p219_p2)   ;;  %vm319_vm0 = vcmask (!%p219_p2), 130048   ;;  %v923_v8 = vld [vmem:[%s1095_s2 + $0x10] sm:$0xff] (!%p219_p2)   ;;  %vm429_vm1 = vcmask (!%p219_p2), 519168  }
   0x6   : > { %222 = sbr.rel (%p219_p2) target bundleno = 460 (0x1cc), region = 36  ;;  %p259_p3 = scmp.lt.s32.totalorder (!%p219_p2), %s791_s25, 15  ;;  %863 = vmatprep.subr.bf16.mxu0 (!%p219_p2), %v913_v0  ;;  %v918_v1 = vld [vmem:[%s1096_s3] sm:$0xff] (!%p219_p2)   ;;  %v920_v4 = vld [vmem:[%s1096_s3 + $0x8] sm:$0xff] (!%p219_p2)   ;;  %v922_v9 = vld [vmem:[%s1096_s3 + $0x10] sm:$0xff] (!%p219_p2)   ;;  %vm470_vm2 = vcmask (!%p219_p2), 523264  }
   0x7   : > { %864 = vmatpush3.bf16.msra.mxu0 (!%p219_p2), %v913_v0  ;;  %v919_v2 = vld [vmem:[%s1095_s2] sm:$0xff] (!%p219_p2)   ;;  %v924_v11 = vld [vmem:[%s1096_s3 + $0x18] sm:$0xff] (!%p219_p2)   ;;  %vm548_vm3 = vcmask (!%p219_p2), 64512  }
   0x8   : > { %889 = vmatprep.subr.bf16.mxu0 (!%p219_p2), %v918_v1  ;;  %873 = vmatprep.subr.bf16.mxu1 (!%p219_p2), %v919_v2  ;;  %v925_v12 = vld [vmem:[%s1095_s2 + $0x18] sm:$0xff] (!%p219_p2)  }
   0x9   : > { %874 = vmatpush3.bf16.msra.mxu1 (!%p219_p2), %v919_v2 }
   0xa   : > { %875 = vmatprep.subr.bf16.mxu1 (!%p219_p2), %v921_v3 }
   0xd   : > { %s1101_s25 = smov (!%p259_p3, %s791_s25), 15  ;;  %876 = vmatpush3.bf16.msra.mxu1 %v921_v3 }
   0xe   : > { %s792_s30 = sshll.u32 %s1101_s25, 2  ;;  %877 = vmatprep.subr.bf16.mxu1 %v923_v8  ;;  %s796_s27 = sshll.u32 %s1101_s25, 3 }
   0xf   : > { %s262_s11 = scalar_lea.vmem %s1093_s0, %s792_s30  ;;  %s1021_s26 = scalar_lea.vmem %s1097_s4, %s792_s30 }
  0x10   : > { %v914_v5 = vld [vmem:[%s262_s11] sm:$0xff]   ;;  %v915_v6 = vld [vmem:[%s262_s11 + $0x8] sm:$0xff]   ;;  %v916_v7 = vld [vmem:[%s262_s11 + $0x10] sm:$0xff]   ;;  %s1051_s30 = scalar_lea.vmem %s1098_s5, %s796_s27  ;;  %s1056_s9 = scalar_lea.vmem %s1099_s6, %s796_s27 }
  0x11   : > { %865 = vmatprep.mubr.msk.bf16.mxu0 %vm319_vm0, %v914_v5  ;;  %v917_v10 = vld [vmem:[%s262_s11 + $0x18] sm:$0xff]   ;;  %878 = vmatpush3.bf16.msra.mxu1 %v923_v8 }
  0x12   : > { %866 = vmatmul.mubr.msk.bf16.vlgmr.msra.gmra.mrb[0].mxu0 %vm319_vm0, %v915_v6  ;;  %879 = vmatprep.subr.bf16.mxu1 %v925_v12 }
  0x13   : > { %869 = vmatprep.mubr.msk.bf16.mxu0 %vm319_vm0, %v916_v7  ;;  %890 = vmatpush3.bf16.msra.mxu0 %v918_v1 }
  0x14   : > { %891 = vmatprep.subr.bf16.mxu0 %v920_v4 }
  0x15   : > { %880 = vmatpush3.bf16.msra.mxu1 %v925_v12 }
  0x17   : > { %892 = vmatpush3.bf16.msra.mxu0 %v920_v4 }
  0x18   : > { %893 = vmatprep.subr.bf16.mxu0 %v922_v9 }
  0x1a   : > { %870 = vmatmul.mubr.msk.bf16.gmra.mrb[4].mxu0 %vm319_vm0, %v917_v10 }
  0x1b   : > { %894 = vmatpush3.bf16.msra.mxu0 %v922_v9 }
  0x1c   : > { %895 = vmatprep.subr.bf16.mxu0 %v924_v11 }
  0x1f   : > { %896 = vmatpush3.bf16.msra.mxu0 %v924_v11 }
  0xe5   : > { %v867_v13 = vpop.f32.mrb[0].mxu0 }
  0xe6   : > { %v836_v14 = vpack.c.bf16 %v867_v13, %v867_v13  ;;  %v366_v15 = vpop.f32.mrb[1].mxu0 }
  0xe7   : > { %v834_v16 = vpack.c.bf16 %v366_v15, %v366_v15  ;;  %v868_v17 = vpop.f32.mrb[2].mxu0 }
  0xe8   : > { %432 = vst.msk [vmem:[%s1021_s26 + $0x8] sm:$0xf] %vm429_vm1, %v836_v14  ;;  %v398_v18 = vpack.c.bf16 %v868_v17, %v867_v13  ;;  %v837_v19 = vpack.c.bf16 %v868_v17, %v868_v17  ;;  %v369_v20 = vpop.f32.mrb[3].mxu0 }
  0xe9   : > { %430 = vst.msk [vmem:[%s1021_s26] sm:$0xf] %vm429_vm1, %v834_v16  ;;  %v835_v21 = vpack.c.bf16 %v369_v20, %v369_v20  ;;  %v397_v22 = vpack.c.bf16 %v369_v20, %v366_v15 }
  0xea   : > { %433 = vst.msk [vmem:[%s1021_s26 + $0xc] sm:$0xf] %vm429_vm1, %v837_v19 }
  0xeb   : > { %431 = vst.msk [vmem:[%s1021_s26 + $0x4] sm:$0xf] %vm429_vm1, %v835_v21  ;;  %881 = vmatprep.mubr.msk.bf16.mxu1 %vm470_vm2, %v397_v22  ;;  %897 = vmatprep.mubr.msk.bf16.mxu0 %vm470_vm2, %v397_v22 }
  0xec   : > { %882 = vmatmul.mubr.msk.bf16.vlgmr.msra.gmra.mrb[0].mxu1 %vm470_vm2, %v398_v18  ;;  %898 = vmatmul.mubr.msk.bf16.vlgmr.msra.gmra.mrb[8].mxu0 %vm470_vm2, %v398_v18 }
  0xed   : > { %v871_v23 = vpop.f32.mrb[4].mxu0 }
  0xee   : > { %v840_v24 = vpack.c.bf16 %v871_v23, %v871_v23  ;;  %v382_v25 = vpop.f32.mrb[5].mxu0 }
  0xef   : > { %v838_v26 = vpack.c.bf16 %v382_v25, %v382_v25  ;;  %v872_v27 = vpop.f32.mrb[6].mxu0 }
  0xf0   : > { %436 = vst.msk [vmem:[%s1021_s26 + $0x18] sm:$0xf] %vm429_vm1, %v840_v24  ;;  %v400_v28 = vpack.c.bf16 %v872_v27, %v871_v23  ;;  %v841_v29 = vpack.c.bf16 %v872_v27, %v872_v27  ;;  %v385_v30 = vpop.f32.mrb[7].mxu0 }
  0xf1   : > { %434 = vst.msk [vmem:[%s1021_s26 + $0x10] sm:$0xf] %vm429_vm1, %v838_v26  ;;  %v399_v31 = vpack.c.bf16 %v385_v30, %v382_v25  ;;  %v839_v32 = vpack.c.bf16 %v385_v30, %v385_v30 }
  0xf2   : > { %437 = vst.msk [vmem:[%s1021_s26 + $0x1c] sm:$0xf] %vm429_vm1, %v841_v29 }
  0xf3   : > { %435 = vst.msk [vmem:[%s1021_s26 + $0x14] sm:$0xf] %vm429_vm1, %v839_v32  ;;  %885 = vmatprep.mubr.msk.bf16.mxu1 %vm470_vm2, %v399_v31  ;;  %901 = vmatprep.mubr.msk.bf16.mxu0 %vm470_vm2, %v399_v31 }
  0xf4   : > { %886 = vmatmul.mubr.msk.bf16.gmra.mrb[4].mxu1 %vm470_vm2, %v400_v28  ;;  %902 = vmatmul.mubr.msk.bf16.gmra.mrb[12].mxu0 %vm470_vm2, %v400_v28 }
 0x1bf   : > { %v883_v33 = vpop.f32.mrb[0].mxu1  ;;  %v899_v34 = vpop.f32.mrb[8].mxu0 }
 0x1c0   : > { %551 = vst.msk [vmem:[%s1051_s30 + $0x10] sm:$0xff] %vm548_vm3, %v883_v33  ;;  %656 = vst.msk [vmem:[%s1056_s9 + $0x10] sm:$0xff] %vm548_vm3, %v899_v34  ;;  %v517_v35 = vpop.f32.mrb[1].mxu1  ;;  %v623_v36 = vpop.f32.mrb[9].mxu0 }
 0x1c1   : > { %549 = vst.msk [vmem:[%s1051_s30] sm:$0xff] %vm548_vm3, %v517_v35  ;;  %654 = vst.msk [vmem:[%s1056_s9] sm:$0xff] %vm548_vm3, %v623_v36  ;;  %v884_v37 = vpop.f32.mrb[2].mxu1  ;;  %v900_v38 = vpop.f32.mrb[10].mxu0 }
 0x1c2   : > { %552 = vst.msk [vmem:[%s1051_s30 + $0x18] sm:$0xff] %vm548_vm3, %v884_v37  ;;  %657 = vst.msk [vmem:[%s1056_s9 + $0x18] sm:$0xff] %vm548_vm3, %v900_v38  ;;  %v520_v39 = vpop.f32.mrb[3].mxu1  ;;  %v626_v40 = vpop.f32.mrb[11].mxu0 }
 0x1c3   : > { %550 = vst.msk [vmem:[%s1051_s30 + $0x8] sm:$0xff] %vm548_vm3, %v520_v39  ;;  %655 = vst.msk [vmem:[%s1056_s9 + $0x8] sm:$0xff] %vm548_vm3, %v626_v40 }
 0x1c7   : > { %v887_v41 = vpop.f32.mrb[4].mxu1  ;;  %v903_v42 = vpop.f32.mrb[12].mxu0 }
 0x1c8   : > { %555 = vst.msk [vmem:[%s1051_s30 + $0x30] sm:$0xff] %vm548_vm3, %v887_v41  ;;  %660 = vst.msk [vmem:[%s1056_s9 + $0x30] sm:$0xff] %vm548_vm3, %v903_v42  ;;  %v533_v43 = vpop.f32.mrb[5].mxu1  ;;  %v639_v44 = vpop.f32.mrb[13].mxu0 }
 0x1c9   : > { %553 = vst.msk [vmem:[%s1051_s30 + $0x20] sm:$0xff] %vm548_vm3, %v533_v43  ;;  %658 = vst.msk [vmem:[%s1056_s9 + $0x20] sm:$0xff] %vm548_vm3, %v639_v44  ;;  %v888_v45 = vpop.f32.mrb[6].mxu1  ;;  %v904_v46 = vpop.f32.mrb[14].mxu0 }
 0x1ca   : > { %556 = vst.msk [vmem:[%s1051_s30 + $0x38] sm:$0xff] %vm548_vm3, %v888_v45  ;;  %661 = vst.msk [vmem:[%s1056_s9 + $0x38] sm:$0xff] %vm548_vm3, %v904_v46  ;;  %v536_v47 = vpop.f32.mrb[7].mxu1  ;;  %v642_v48 = vpop.f32.mrb[15].mxu0 }
 0x1cb   : > { %554 = vst.msk [vmem:[%s1051_s30 + $0x28] sm:$0xff] %vm548_vm3, %v536_v47  ;;  %659 = vst.msk [vmem:[%s1056_s9 + $0x28] sm:$0xff] %vm548_vm3, %v642_v48 }
 0x1cc PF: > { %s17_s21 = sadd.s32 1, %s932_s21  }
 0x1cd   : > { %p14_p4 = scmp.ge.s32.totalorder %s17_s21, 4  }
 0x1cf   :  { %16 = sbr.rel (!%p14_p4) target bundleno = 1 (0x1), region = 90 }

</bundles_post_ra>
